<compile_context>
chip_gen: v7x
topology: tpu7x:2x2x1
jax: 0.10.0
libtpu: 0.0.40
codegen_flags: <defaults>
</compile_context>

<pallas_src>
import jax
import jax.numpy as jnp
from jax import lax
from jax.experimental import pallas as pl
from jax.experimental.pallas import tpu as pltpu


H1 = 125    # fc1 / fa1 width
H2 = 250    # fca1 width (= 2 * H1)
H2P = 256   # lane-padded hidden width
OUTP = 128  # lane-dense padded output width (wrapper slices column 0)


# ----------------------------- Pallas kernel ------------------------------ #
def critic_kernel(x_ref, w1_ref, b1_ref, w2_ref, b2_ref, w3_ref, b3_ref,
                  out_ref):
    # Stage 1 (fused fc1/fa1 + concat): one bf16 MXU dot, f32 accumulate.
    # x is bf16 [TB, state_dim+action_dim]; w1 is the stacked block-diagonal
    # weight so xs lands in cols [0:125) and xa in cols [125:250).
    h1 = jnp.dot(x_ref[...], w1_ref[...],
                 preferred_element_type=jnp.float32,
                 precision=lax.Precision.DEFAULT) + b1_ref[...]
    h1 = jnp.maximum(h1, 0.0)                      # f32 elementwise (v5e-safe)

    # Stage 2: single 256x256 bf16 matmul, f32 accumulate; bias + relu in f32.
    h2 = jnp.dot(h1.astype(jnp.bfloat16), w2_ref[...],
                 preferred_element_type=jnp.float32,
                 precision=lax.Precision.DEFAULT) + b2_ref[...]
    h2 = jnp.maximum(h2, 0.0)

    # Stage 3: 250 -> 1 head on the MXU with a (256, 128) weight (only column 0
    # nonzero).  Output block is lane-dense (TB, 128) -> unmasked vst's; the
    # wrapper slices [:, :1].
    v = jnp.dot(h2.astype(jnp.bfloat16), w3_ref[...],
                preferred_element_type=jnp.float32,
                precision=lax.Precision.DEFAULT) + b3_ref[...]
    out_ref[...] = v.astype(out_ref.dtype)


# ------------------------ one-time weight preparation ----------------------- #
def prepare_critic_params(params):
    """Transpose + zero-pad + bf16-cast the PyTorch-layout params.  Call ONCE."""
    w_fc1, b_fc1 = params["fc1"]      # (125, state_dim), (125,)
    w_fa1, b_fa1 = params["fa1"]      # (125, action_dim), (125,)
    w_fca1, b_fca1 = params["fca1"]   # (250, 250), (250,)
    w_fca2, b_fca2 = params["fca2"]   # (1, 250), (1,)

    state_dim = w_fc1.shape[1]
    action_dim = w_fa1.shape[1]
    K1 = state_dim + action_dim

    f32, bf16 = jnp.float32, jnp.bfloat16

    # Stage-1 stacked weight: rows [:state_dim] feed cols [0:125),
    # rows [state_dim:] feed cols [125:250); padding cols zero.
    w1 = jnp.zeros((K1, H2P), f32)
    w1 = w1.at[:state_dim, :H1].set(w_fc1.T)
    w1 = w1.at[state_dim:, H1:H2].set(w_fa1.T)
    b1 = (jnp.zeros((1, H2P), f32)
          .at[0, :H1].set(b_fc1)
          .at[0, H1:H2].set(b_fa1))

    # Stage-2 weight: zero-padded transpose of W_fca1.
    w2 = jnp.zeros((H2P, H2P), f32).at[:H2, :H2].set(w_fca1.T)
    b2 = jnp.zeros((1, H2P), f32).at[0, :H2].set(b_fca1)

    # Stage-3 weight: (256, 128) with only column 0 nonzero; scalar bias.
    w3 = jnp.zeros((H2P, OUTP), f32).at[:H2, 0].set(w_fca2.reshape(-1))
    b3 = b_fca2.reshape(1, 1).astype(f32)

    # MXU operands bf16; biases stay f32 (elementwise path).
    return (w1.astype(bf16), b1, w2.astype(bf16), b2, w3.astype(bf16), b3)


# --------------------------------- wrapper ---------------------------------- #
def _choose_batch_tile(B, batch_tile):
    if B <= 8:
        return B                       # single full block (rows == array dim)
    # >= 2 grid steps (v7x megacore), rows a multiple of 8, capped at batch_tile.
    half = ((-(-B // 2)) + 7) // 8 * 8
    return min(batch_tile, half)


def critic_forward(state, action, prepped, *, batch_tile=1024):
    """state: [B, state_dim], action: [B, action_dim] -> [B, 1] (float32)."""
    w1, b1, w2, b2, w3, b3 = prepped
    B = state.shape[0]
    K1 = w1.shape[0]

    # Fuse the two inputs once in the wrapper; cast the MXU operand to bf16
    # (halves the per-step input DMA too).
    x = jnp.concatenate([state, action], axis=1).astype(jnp.bfloat16)

    TB = _choose_batch_tile(B, batch_tile)
    grid = (pl.cdiv(B, TB),)

    const2d = lambda i: (0, 0)
    in_specs = [
        pl.BlockSpec((TB, K1), lambda i: (i, 0)),   # fused [state|action]
        pl.BlockSpec(w1.shape, const2d),            # stacked stage-1 weight
        pl.BlockSpec(b1.shape, const2d),
        pl.BlockSpec(w2.shape, const2d),
        pl.BlockSpec(b2.shape, const2d),
        pl.BlockSpec(w3.shape, const2d),
        pl.BlockSpec(b3.shape, const2d),
    ]
    out_specs = pl.BlockSpec((TB, OUTP), lambda i: (i, 0))

    weight_bytes = sum(int(a.size) * a.dtype.itemsize
                       for a in (w1, b1, w2, b2, w3, b3))
    cost = pl.CostEstimate(
        flops=2 * B * (K1 * H2P + H2P * H2P + H2P * OUTP),
        transcendentals=0,
        bytes_accessed=int(x.size) * 2 + weight_bytes + B * OUTP * 4,
    )

    out_pad = pl.pallas_call(
        critic_kernel,
        out_shape=jax.ShapeDtypeStruct((B, OUTP), jnp.float32),
        grid=grid,
        in_specs=in_specs,
        out_specs=out_specs,
        compiler_params=pltpu.CompilerParams(
            dimension_semantics=("parallel",),     # megacore sharding on v7x
            vmem_limit_bytes=32 << 20,
        ),
        cost_estimate=cost,
    )(x, w1, b1, w2, b2, w3, b3)

    return out_pad[:, :1]


# ------------------------- deterministic param init ------------------------ #
def xavier_uniform(key, out_f, in_f):
    bound = jnp.sqrt(6.0 / (in_f + out_f))
    return jax.random.uniform(key, (out_f, in_f), jnp.float32, -bound, bound)


def init_critic_params(key, state_dim, action_dim):
    k1, k2, k3, k4 = jax.random.split(key, 4)
    return {
        "fc1":  (xavier_uniform(k1, 125, state_dim),  jnp.full((125,), 0.01, jnp.float32)),
        "fa1":  (xavier_uniform(k2, 125, action_dim), jnp.full((125,), 0.01, jnp.float32)),
        "fca1": (xavier_uniform(k3, 250, 250),        jnp.full((250,), 0.01, jnp.float32)),
        "fca2": (xavier_uniform(k4, 1, 250),          jnp.full((1,),   0.01, jnp.float32)),
    }


def critic_reference(state, action, params):
    """Pure-JAX f32 reference mirroring the PyTorch forward."""
    w1, b1 = params["fc1"]
    wa, ba = params["fa1"]
    wc1, bc1 = params["fca1"]
    wc2, bc2 = params["fca2"]
    xs = jax.nn.relu(state @ w1.T + b1)
    xa = jax.nn.relu(action @ wa.T + ba)
    x = jnp.concatenate([xs, xa], axis=1)
    h = jax.nn.relu(x @ wc1.T + bc1)
    return h @ wc2.T + bc2


# ---------------------------------- main ----------------------------------- #
if __name__ == "__main__":
    key = jax.random.PRNGKey(0)
    k_params, k_state, k_action = jax.random.split(key, 3)

    B, state_dim, action_dim = 2, 16, 4
    params = init_critic_params(k_params, state_dim, action_dim)
    state = jax.random.normal(k_state, (B, state_dim), jnp.float32)
    action = jax.random.normal(k_action, (B, action_dim), jnp.float32)

    # One-time weight preparation (padded / transposed / bf16 layout).
    prepped = jax.tree_util.tree_map(jax.block_until_ready,
                                     prepare_critic_params(params))

    out = jax.block_until_ready(critic_forward(state, action, prepped))
    ref = critic_reference(state, action, params)
    assert out.shape == (B, 1)
    # bf16 MXU operands with f32 accumulation -> loosened tolerance vs f32 ref.
    assert jnp.allclose(out, ref, atol=3e-2, rtol=3e-2), (out, ref)

    # Boundary case: B not a multiple of the batch tile, multi-step grid
    # (exercises masked writeback on the last block).
    B2 = 37
    k_s2, k_a2 = jax.random.split(jax.random.PRNGKey(1))
    state2 = jax.random.normal(k_s2, (B2, state_dim), jnp.float32)
    action2 = jax.random.normal(k_a2, (B2, action_dim), jnp.float32)
    out2 = jax.block_until_ready(critic_forward(state2, action2, prepped))
    ref2 = critic_reference(state2, action2, params)
    assert out2.shape == (B2, 1)
    assert jnp.allclose(out2, ref2, atol=3e-2, rtol=3e-2), (out2, ref2)

    print("KERNEL_OK")
</pallas_src>

<mosaic_0001>
module attributes {stable_mosaic.version = 11 : i64} {
  func.func @critic_kernel(%arg0: i32, %arg1: memref<2x20xbf16, #tpu.memory_space<vmem>>, %arg2: memref<20x256xbf16, #tpu.memory_space<vmem>>, %arg3: memref<1x256xf32, #tpu.memory_space<vmem>>, %arg4: memref<256x256xbf16, #tpu.memory_space<vmem>>, %arg5: memref<1x256xf32, #tpu.memory_space<vmem>>, %arg6: memref<256x128xbf16, #tpu.memory_space<vmem>>, %arg7: memref<1x1xf32, #tpu.memory_space<vmem>>, %arg8: memref<2x128xf32, #tpu.memory_space<vmem>>) attributes {dimension_semantics = [#tpu.dimension_semantics<parallel>], iteration_bounds = array<i64: 1>, scalar_prefetch = 0 : i64, scratch_operands = 0 : i64, tpu.core_type = #tpu.core_type<tc>, window_params = [{transform_indices = @transform_0, window_bounds = array<i64: 2, 20>}, {pipeline_mode = #tpu.pipeline_mode<synchronous>, transform_indices = @transform_1, window_bounds = array<i64: 20, 256>}, {pipeline_mode = #tpu.pipeline_mode<synchronous>, transform_indices = @transform_2, window_bounds = array<i64: 1, 256>}, {pipeline_mode = #tpu.pipeline_mode<synchronous>, transform_indices = @transform_3, window_bounds = array<i64: 256, 256>}, {pipeline_mode = #tpu.pipeline_mode<synchronous>, transform_indices = @transform_4, window_bounds = array<i64: 1, 256>}, {pipeline_mode = #tpu.pipeline_mode<synchronous>, transform_indices = @transform_5, window_bounds = array<i64: 256, 128>}, {pipeline_mode = #tpu.pipeline_mode<synchronous>, transform_indices = @transform_6, window_bounds = array<i64: 1, 1>}, {transform_indices = @transform_7, window_bounds = array<i64: 2, 128>}]} {
    %c0 = arith.constant 0 : index
    %c0_0 = arith.constant 0 : index
    %0 = vector.load %arg1[%c0, %c0_0] : memref<2x20xbf16, #tpu.memory_space<vmem>>, vector<2x20xbf16>
    %c0_1 = arith.constant 0 : index
    %c0_2 = arith.constant 0 : index
    %1 = vector.load %arg2[%c0_1, %c0_2] : memref<20x256xbf16, #tpu.memory_space<vmem>>, vector<20x256xbf16>
    %cst = arith.constant dense<0.000000e+00> : vector<2x256xf32>
    %2 = tpu.matmul %0, %1, %cst {dimension_numbers = #tpu.dot_dimension_numbers<[1], [0], [0], [1], [0, 0, 1, 1], [], []>} : vector<2x20xbf16>, vector<20x256xbf16>, vector<2x256xf32> -> vector<2x256xf32>
    %c0_3 = arith.constant 0 : index
    %c0_4 = arith.constant 0 : index
    %3 = vector.load %arg3[%c0_3, %c0_4] : memref<1x256xf32, #tpu.memory_space<vmem>>, vector<1x256xf32>
    %4 = vector.broadcast %3 : vector<1x256xf32> to vector<2x256xf32>
    %5 = arith.addf %2, %4 : vector<2x256xf32>
    %cst_5 = arith.constant 0.000000e+00 : f32
    %6 = vector.broadcast %cst_5 : f32 to vector<2x256xf32>
    %7 = arith.maximumf %5, %6 : vector<2x256xf32>
    %8 = arith.truncf %7 : vector<2x256xf32> to vector<2x256xbf16>
    %c0_6 = arith.constant 0 : index
    %c0_7 = arith.constant 0 : index
    %9 = vector.load %arg4[%c0_6, %c0_7] : memref<256x256xbf16, #tpu.memory_space<vmem>>, vector<256x256xbf16>
    %cst_8 = arith.constant dense<0.000000e+00> : vector<2x256xf32>
    %10 = tpu.matmul %8, %9, %cst_8 {dimension_numbers = #tpu.dot_dimension_numbers<[1], [0], [0], [1], [0, 0, 1, 1], [], []>} : vector<2x256xbf16>, vector<256x256xbf16>, vector<2x256xf32> -> vector<2x256xf32>
    %c0_9 = arith.constant 0 : index
    %c0_10 = arith.constant 0 : index
    %11 = vector.load %arg5[%c0_9, %c0_10] : memref<1x256xf32, #tpu.memory_space<vmem>>, vector<1x256xf32>
    %12 = vector.broadcast %11 : vector<1x256xf32> to vector<2x256xf32>
    %13 = arith.addf %10, %12 : vector<2x256xf32>
    %cst_11 = arith.constant 0.000000e+00 : f32
    %14 = vector.broadcast %cst_11 : f32 to vector<2x256xf32>
    %15 = arith.maximumf %13, %14 : vector<2x256xf32>
    %16 = arith.truncf %15 : vector<2x256xf32> to vector<2x256xbf16>
    %c0_12 = arith.constant 0 : index
    %c0_13 = arith.constant 0 : index
    %17 = vector.load %arg6[%c0_12, %c0_13] : memref<256x128xbf16, #tpu.memory_space<vmem>>, vector<256x128xbf16>
    %cst_14 = arith.constant dense<0.000000e+00> : vector<2x128xf32>
    %18 = tpu.matmul %16, %17, %cst_14 {dimension_numbers = #tpu.dot_dimension_numbers<[1], [0], [0], [1], [0, 0, 1, 1], [], []>} : vector<2x256xbf16>, vector<256x128xbf16>, vector<2x128xf32> -> vector<2x128xf32>
    %c0_15 = arith.constant 0 : index
    %c0_16 = arith.constant 0 : index
    %19 = vector.load %arg7[%c0_15, %c0_16] : memref<1x1xf32, #tpu.memory_space<vmem>>, vector<1x1xf32>
    %20 = vector.broadcast %19 : vector<1x1xf32> to vector<2x128xf32>
    %21 = arith.addf %18, %20 : vector<2x128xf32>
    %c0_17 = arith.constant 0 : index
    %c0_18 = arith.constant 0 : index
    %22 = vector.load %arg8[%c0_17, %c0_18] : memref<2x128xf32, #tpu.memory_space<vmem>>, vector<2x128xf32>
    tpu.vector_store %arg8[%c0_17, %c0_18], %21 {strides = array<i32>} : memref<2x128xf32, #tpu.memory_space<vmem>>, vector<2x128xf32>,
    return
  }
  func.func @transform_0(%arg0: i32) -> (i32, i32) {
    %c0_i32 = arith.constant 0 : i32
    %c0_i32_0 = arith.constant 0 : i32
    return %arg0, %c0_i32 : i32, i32
  }
  func.func @transform_1(%arg0: i32) -> (i32, i32) {
    %c0_i32 = arith.constant 0 : i32
    %c0_i32_0 = arith.constant 0 : i32
    %c0_i32_1 = arith.constant 0 : i32
    return %c0_i32, %c0_i32_0 : i32, i32
  }
  func.func @transform_2(%arg0: i32) -> (i32, i32) {
    %c0_i32 = arith.constant 0 : i32
    %c0_i32_0 = arith.constant 0 : i32
    %c0_i32_1 = arith.constant 0 : i32
    return %c0_i32, %c0_i32_0 : i32, i32
  }
  func.func @transform_3(%arg0: i32) -> (i32, i32) {
    %c0_i32 = arith.constant 0 : i32
    %c0_i32_0 = arith.constant 0 : i32
    %c0_i32_1 = arith.constant 0 : i32
    return %c0_i32, %c0_i32_0 : i32, i32
  }
  func.func @transform_4(%arg0: i32) -> (i32, i32) {
    %c0_i32 = arith.constant 0 : i32
    %c0_i32_0 = arith.constant 0 : i32
    %c0_i32_1 = arith.constant 0 : i32
    return %c0_i32, %c0_i32_0 : i32, i32
  }
  func.func @transform_5(%arg0: i32) -> (i32, i32) {
    %c0_i32 = arith.constant 0 : i32
    %c0_i32_0 = arith.constant 0 : i32
    %c0_i32_1 = arith.constant 0 : i32
    return %c0_i32, %c0_i32_0 : i32, i32
  }
  func.func @transform_6(%arg0: i32) -> (i32, i32) {
    %c0_i32 = arith.constant 0 : i32
    %c0_i32_0 = arith.constant 0 : i32
    %c0_i32_1 = arith.constant 0 : i32
    return %c0_i32, %c0_i32_0 : i32, i32
  }
  func.func @transform_7(%arg0: i32) -> (i32, i32) {
    %c0_i32 = arith.constant 0 : i32
    %c0_i32_0 = arith.constant 0 : i32
    return %arg0, %c0_i32 : i32, i32
  }
}

</mosaic_0001>

<bundles_post_ra>
// kernel: tpu_custom_call.1
= control target key start
LH: loop header
LB: loop body
LE: loop exit
PB: predicated region body
PF: predicated region fallthrough
CT: control target
= control target key end

     0   :  { %s968_s0 = inlined_call_operand.vmem [shape: bf16[2,20], index: 0, kind: input, shape index: {}]   ;;  %s969_s1 = inlined_call_operand.hbm [shape: bf16[20,256], index: 1, kind: input, shape index: {}]   ;;  %s970_s2 = inlined_call_operand.vmem [shape: f32[1,256], index: 2, kind: input, shape index: {}]   ;;  %s971_s3 = inlined_call_operand.hbm [shape: bf16[256,256], index: 3, kind: input, shape index: {}]   ;;  %s972_s4 = inlined_call_operand.vmem [shape: f32[1,256], index: 4, kind: input, shape index: {}]   ;;  %s973_s5 = inlined_call_operand.hbm [shape: bf16[256,128], index: 5, kind: input, shape index: {}]   ;;  %s974_s6 = inlined_call_operand.<no memory space> [shape: f32[1,1], index: 6, kind: input, shape index: {}]   ;;  %s975_s7 = inlined_call_operand.hbm [shape: f32[2,128], index: 7, kind: output, shape index: {}]  }
   0x1   :  { %v12_v0 = vstv %s974_s6 }
   0x2   :  { %13 = vst [vmem:[#allocation2] sm:$0x1] %v12_v0 }
   0x3   :  { %14 = vsyncpa [#allocation4], 0 }
   0x4   :  { %15 = vsyncpa [#allocation7], 0 }
   0x5   :  { %16 = vsyncpa [#allocation5], 0  ;;  %s852_s26 = smov [#allocation6]   ;;  %s853_s28 = smov [#allocation3]  }
   0x6   :  { %s38_s27 = sshll.u32 %s852_s26, 4  ;;  %s24_s29 = sshll.u32 %s853_s28, 4  ;;  %s39_s27 = int_to_ptr.vmem [resolvable:$true] %s38_s27  ;;  %s904_s29 = int_to_ptr.vmem [resolvable:$true] %s24_s29 }
   0x7   :  { %s758_s9 = scalar_lea.hbm %s971_s3, 4096 }
   0x8   :  { %p759_p0 = scmp.ne.s32.totalorder %s971_s3, %s758_s9  ;;  %p762_p1 = scmp.lt.u32.totalorder %s758_s9, %s971_s3 }
   0xa   :  { %p764_p2 = pnand %p762_p1, %p759_p0 }
   0xc   :  { %767 = shalt.err (!%p764_p2)
}
   0xd   :  { %s768_s13 = scalar_lea.vmem %s39_s27, 4096  ;;  %p773_p4 = scmp.lt.s32.totalorder %s39_s27, %s39_s27 }
   0xe   :  { %p769_p3 = scmp.ne.s32.totalorder %s39_s27, %s768_s13  ;;  %p774_p5 = scmp.lt.s32.totalorder %s768_s13, %s768_s13 }
  0x10   :  { %p775_p6 = por %p774_p5, %p773_p4 }
  0x12   :  { %p776_p7 = pnand %p775_p6, %p769_p3 }
  0x14   :  { %779 = shalt.err (!%p776_p7)
}
  0x15   :  { %s854_s14 = smov 128   ;;  %s855_s15 = smov 8  }
  0x16   :  { %44 = dma.hbm_to_vmem [thread:$0]  %s971_s3, 4096, %s39_s27, [#allocation7], %s854_s14, %s854_s14, %s855_s15  }
  0x17   :  { %s780_s20 = scalar_lea.hbm %s969_s1, 384 }
  0x18   :  { %p781_p8 = scmp.ne.s32.totalorder %s969_s1, %s780_s20  ;;  %p784_p9 = scmp.lt.u32.totalorder %s780_s20, %s969_s1 }
  0x1a   :  { %p786_p10 = pnand %p784_p9, %p781_p8 }
  0x1c   :  { %789 = shalt.err (!%p786_p10)
}
  0x1d   :  { %s790_s25 = scalar_lea.vmem %s904_s29, 384  ;;  %p795_p12 = scmp.lt.s32.totalorder %s904_s29, %s904_s29 }
  0x1e   :  { %p791_p11 = scmp.ne.s32.totalorder %s904_s29, %s790_s25  ;;  %p796_p13 = scmp.lt.s32.totalorder %s790_s25, %s790_s25 }
  0x20   :  { %p797_p0 = por %p796_p13, %p795_p12 }
  0x22   :  { %p798_p1 = pnand %p797_p0, %p791_p11 }
  0x24   :  { %801 = shalt.err (!%p798_p1)
}
  0x25   :  { %30 = dma.hbm_to_vmem [thread:$0]  %s969_s1, 384, %s904_s29, [#allocation4], %s854_s14, %s854_s14, %s855_s15  }
  0x26   :  { %s856_s27 = smov [#allocation8]   ;;  %s802_s9 = scalar_lea.hbm %s973_s5, 2048 }
  0x27   :  { %s52_s28 = sshll.u32 %s856_s27, 4  ;;  %p803_p2 = scmp.ne.s32.totalorder %s973_s5, %s802_s9  ;;  %s53_s28 = int_to_ptr.vmem [resolvable:$true] %s52_s28 }
  0x28   :  { %p806_p3 = scmp.lt.u32.totalorder %s802_s9, %s973_s5 }
  0x2a   :  { %p808_p4 = pnand %p806_p3, %p803_p2 }
  0x2c   :  { %811 = shalt.err (!%p808_p4)
}
  0x2d   :  { %s812_s13 = scalar_lea.vmem %s53_s28, 2048  ;;  %p817_p6 = scmp.lt.s32.totalorder %s53_s28, %s53_s28 }
  0x2e   :  { %p813_p5 = scmp.ne.s32.totalorder %s53_s28, %s812_s13  ;;  %p818_p7 = scmp.lt.s32.totalorder %s812_s13, %s812_s13 }
  0x30   :  { %p819_p8 = por %p818_p7, %p817_p6 }
  0x32   :  { %p820_p9 = pnand %p819_p8, %p813_p5 }
  0x34   :  { %823 = shalt.err (!%p820_p9)
}
  0x35   :  { %s857_s1 = smov 64   ;;  %s858_s29 = smov 4  }
  0x36   :  { %58 = dma.hbm_to_vmem [thread:$0]  %s973_s5, 2048, %s53_s28, [#allocation7], %s857_s1, %s857_s1, %s858_s29  }
  0x37   :  { %846 = dma.done.wait [#allocation4], 384  }
  0x38   :  { %847 = vsyncadd [#allocation4], 4294966912 }
  0x39   :  { %848 = dma.done.wait [#allocation7], 6144  }
  0x3a   :  { %849 = vsyncadd [#allocation7], 4294961152  ;;  %v859_v1 = vmov 0   ;;  %v689_v2 = vld [vmem:[#allocation3 + $0x4] ss:$8 sps:$4 sm:$0xff]   ;;  %vm106_vm0 = vcmask 1041408   ;;  %v77_v53 = vlaneseq }
  0x3b   :  { %145 = vmatprep.mubr.bf16.mxu0 %v859_v1  ;;  %688 = vset.pattern.permute.xlu0 %v859_v1  ;;  %v691_v3 = vld [vmem:[#allocation3] ss:$8 sps:$4 sm:$0xff]   ;;  %v74_v4 = vld [vmem:[#allocation3 + $0x10] sm:$0x33]  ;;  %v694_v7 = vld [vmem:[#allocation6 + $0x4] ss:$8 sps:$4 sm:$0xff]  }
  0x3c   :  { %113 = vmatprep.subr.bf16.mxu0 %v689_v2  ;;  %v605_v5 = vcombine.high %v74_v4, %v74_v4  ;;  %v604_v6 = vcombine.low %v74_v4, %v74_v4  ;;  %v696_v8 = vld [vmem:[#allocation6] ss:$8 sps:$4 sm:$0xff]   ;;  %362 = vmatprep.subr.bf16.mxu1 %v694_v7  ;;  %v697_v10 = vld [vmem:[#allocation6 + $0x14] ss:$8 sps:$4 sm:$0xff]   ;;  %v699_v11 = vld [vmem:[#allocation6 + $0x10] ss:$8 sps:$4 sm:$0xff]  }
  0x3d   :  { %114 = vmatpush1.bf16.msra.mxu0 %v691_v3  ;;  %363 = vmatpush1.bf16.msra.mxu1 %v696_v8  ;;  %v700_v12 = vld [vmem:[#allocation6 + $0x24] ss:$8 sps:$4 sm:$0xff]   ;;  %vm102_vm1 = vcmask 162816   ;;  %v702_v14 = vld [vmem:[#allocation6 + $0x20] ss:$8 sps:$4 sm:$0xff]   ;;  %v746_v45 = vld [vmem:[#allocation8 + $0x50] sm:$0xff]  }
  0x3e   :  { %606 = vmatprep.subr.msk.bf16.mxu0 %vm106_vm0, %v605_v5  ;;  %v108_v9 = vsel %vm106_vm0, %v604_v6, 0  ;;  %364 = vmatprep.subr.bf16.mxu1 %v697_v10  ;;  %v71_v13 = vld [vmem:[%s968_s0] sm:$0x1]  ;;  %v703_v15 = vld [vmem:[#allocation6 + $0x34] ss:$8 sps:$4 sm:$0xff]   ;;  %v744_v43 = vld [vmem:[#allocation8 + $0x48] sm:$0xff]  }
  0x3f   :  { %v705_v16 = vld [vmem:[#allocation6 + $0x30] ss:$8 sps:$4 sm:$0xff]   ;;  %v706_v17 = vld [vmem:[#allocation6 + $0x44] ss:$8 sps:$4 sm:$0xff]   ;;  %v708_v18 = vld [vmem:[#allocation6 + $0x40] ss:$8 sps:$4 sm:$0xff]  }
  0x40   :  { %v709_v19 = vld [vmem:[#allocation6 + $0x54] ss:$8 sps:$4 sm:$0xff]   ;;  %v711_v20 = vld [vmem:[#allocation6 + $0x50] ss:$8 sps:$4 sm:$0xff]   ;;  %v712_v21 = vld [vmem:[#allocation6 + $0x64] ss:$8 sps:$4 sm:$0xff]  }
  0x41   :  { %116 = vmatpush1.bf16.msra.mxu0 %v108_v9  ;;  %365 = vmatpush1.bf16.msra.mxu1 %v699_v11  ;;  %v714_v22 = vld [vmem:[#allocation6 + $0x60] ss:$8 sps:$4 sm:$0xff]   ;;  %v715_v23 = vld [vmem:[#allocation6 + $0x74] ss:$8 sps:$4 sm:$0xff]   ;;  %v717_v24 = vld [vmem:[#allocation6 + $0x70] ss:$8 sps:$4 sm:$0xff]  }
  0x42   :  { %366 = vmatprep.subr.bf16.mxu1 %v700_v12  ;;  %v718_v25 = vld [vmem:[#allocation6 + $0x84] ss:$8 sps:$4 sm:$0xff]   ;;  %v720_v26 = vld [vmem:[#allocation6 + $0x80] ss:$8 sps:$4 sm:$0xff]   ;;  %v721_v27 = vld [vmem:[#allocation6 + $0x94] ss:$8 sps:$4 sm:$0xff]  }
  0x43   :  { %v723_v28 = vld [vmem:[#allocation6 + $0x90] ss:$8 sps:$4 sm:$0xff]   ;;  %v724_v29 = vld [vmem:[#allocation6 + $0xa4] ss:$8 sps:$4 sm:$0xff]   ;;  %v726_v30 = vld [vmem:[#allocation6 + $0xa0] ss:$8 sps:$4 sm:$0xff]  }
  0x44   :  { %607 = vmatmul.mubr.msk.bf16.vlgmr.msra.gmra.mrb[0].mxu0 %vm102_vm1, %v71_v13  ;;  %v727_v31 = vld [vmem:[#allocation6 + $0xb4] ss:$8 sps:$4 sm:$0xff]   ;;  %v729_v32 = vld [vmem:[#allocation6 + $0xb0] ss:$8 sps:$4 sm:$0xff]   ;;  %v730_v33 = vld [vmem:[#allocation6 + $0xc4] ss:$8 sps:$4 sm:$0xff]  }
  0x45   :  { %367 = vmatpush1.bf16.msra.mxu1 %v702_v14  ;;  %v732_v34 = vld [vmem:[#allocation6 + $0xc0] ss:$8 sps:$4 sm:$0xff]   ;;  %v733_v35 = vld [vmem:[#allocation6 + $0xd4] ss:$8 sps:$4 sm:$0xff]   ;;  %v735_v36 = vld [vmem:[#allocation6 + $0xd0] ss:$8 sps:$4 sm:$0xff]  }
  0x46   :  { %368 = vmatprep.subr.bf16.mxu1 %v703_v15  ;;  %v736_v37 = vld [vmem:[#allocation6 + $0xe4] ss:$8 sps:$4 sm:$0xff]   ;;  %v738_v38 = vld [vmem:[#allocation6 + $0xe0] ss:$8 sps:$4 sm:$0xff]   ;;  %v739_v39 = vld [vmem:[#allocation6 + $0xf4] ss:$8 sps:$4 sm:$0xff]  }
  0x47   :  { %v741_v40 = vld [vmem:[#allocation6 + $0xf0] ss:$8 sps:$4 sm:$0xff]   ;;  %v742_v41 = vld [vmem:[#allocation8 + $0x40] sm:$0xff]   ;;  %v745_v44 = vld [vmem:[#allocation8 + $0x8] sm:$0xff]   ;;  %v78_v54 = vshrl.u32 %v77_v53, 7  ;;  %s860_s19 = smov [#allocation9]  }
  0x48   :  { %v743_v42 = vld [vmem:[#allocation8] sm:$0xff]   ;;  %657 = vmatprep.subr.bf16.mxu0 %v742_v41  ;;  %v747_v46 = vld [vmem:[#allocation8 + $0x10] sm:$0xff]   ;;  %v748_v47 = vld [vmem:[#allocation8 + $0x58] sm:$0xff]   ;;  %s592_s20 = sshll.u32 %s860_s19, 4  ;;  %s593_s20 = int_to_ptr.vmem [resolvable:$true] %s592_s20 }
  0x49   :  { %369 = vmatpush1.bf16.msra.mxu1 %v705_v16  ;;  %658 = vmatpush3.bf16.msra.mxu0 %v743_v42  ;;  %v749_v48 = vld [vmem:[#allocation8 + $0x18] sm:$0xff]   ;;  %v750_v49 = vld [vmem:[#allocation8 + $0x60] sm:$0xff]   ;;  %v752_v51 = vld [vmem:[#allocation8 + $0x68] sm:$0xff]   ;;  %v79_v55 = vsub.s32 0, %v78_v54  ;;  %v83_v57 = vsub.s32 1, %v78_v54  ;;  %p829_p11 = scmp.lt.s32.totalorder %s593_s20, %s593_s20 }
  0x4a   :  { %370 = vmatprep.subr.bf16.mxu1 %v706_v17  ;;  %659 = vmatprep.subr.bf16.mxu0 %v744_v43  ;;  %v751_v50 = vld [vmem:[#allocation8 + $0x20] sm:$0xff]   ;;  %v753_v52 = vld [vmem:[#allocation8 + $0x28] sm:$0xff]   ;;  %v754_v6 = vld [vmem:[#allocation8 + $0x70] sm:$0xff]  }
  0x4b   :  { %v75_v56 = vld [vmem:[%s970_s2] sm:$0x3]  ;;  %v755_v7 = vld [vmem:[#allocation8 + $0x30] sm:$0xff]   ;;  %v756_v8 = vld [vmem:[#allocation8 + $0x78] sm:$0xff]  }
  0x4c   :  { %v80_v58 = vrot.slane %v75_v56, %v79_v55  ;;  %v84_v59 = vrot.slane %v75_v56, %v83_v57  ;;  %v757_v9 = vld [vmem:[#allocation8 + $0x38] sm:$0xff]   ;;  %v640_v10 = vld [vmem:[#allocation2] ss:$0 sm:$0xff] }
  0x4d   :  { %371 = vmatpush1.bf16.msra.mxu1 %v708_v18  ;;  %660 = vmatpush3.bf16.msra.mxu0 %v745_v44  ;;  %v190_v11 = vld [vmem:[%s972_s4] sm:$0x3]  ;;  %s824_s4 = scalar_lea.vmem %s593_s20, 32 }
  0x4e   :  { %372 = vmatprep.subr.bf16.mxu1 %v709_v19  ;;  %661 = vmatprep.subr.bf16.mxu0 %v746_v45  ;;  %v195_v12 = vrot.slane %v190_v11, %v79_v55  ;;  %v199_v13 = vrot.slane %v190_v11, %v83_v57  ;;  %p825_p10 = scmp.ne.s32.totalorder %s593_s20, %s824_s4  ;;  %p830_p12 = scmp.lt.s32.totalorder %s824_s4, %s824_s4 }
  0x4f   :  { %446 = vperm.xlu0 %688, %v640_v10  }
  0x50   :  { %p831_p13 = por %p830_p12, %p829_p11 }
  0x51   :  { %373 = vmatpush1.bf16.msra.mxu1 %v711_v20  ;;  %662 = vmatpush3.bf16.msra.mxu0 %v747_v46 }
  0x52   :  { %374 = vmatprep.subr.bf16.mxu1 %v712_v21  ;;  %663 = vmatprep.subr.bf16.mxu0 %v748_v47  ;;  %p832_p0 = pnand %p831_p13, %p825_p10 }
  0x55   :  { %375 = vmatpush1.bf16.msra.mxu1 %v714_v22  ;;  %664 = vmatpush3.bf16.msra.mxu0 %v749_v48 }
  0x56   :  { %376 = vmatprep.subr.bf16.mxu1 %v715_v23  ;;  %665 = vmatprep.subr.bf16.mxu0 %v750_v49 }
  0x59   :  { %377 = vmatpush1.bf16.msra.mxu1 %v717_v24  ;;  %666 = vmatpush3.bf16.msra.mxu0 %v751_v50 }
  0x5a   :  { %378 = vmatprep.subr.bf16.mxu1 %v718_v25  ;;  %667 = vmatprep.subr.bf16.mxu0 %v752_v51 }
  0x5d   :  { %379 = vmatpush1.bf16.msra.mxu1 %v720_v26  ;;  %668 = vmatpush3.bf16.msra.mxu0 %v753_v52 }
  0x5e   :  { %380 = vmatprep.subr.bf16.mxu1 %v721_v27  ;;  %669 = vmatprep.subr.bf16.mxu0 %v754_v6 }
  0x61   :  { %381 = vmatpush1.bf16.msra.mxu1 %v723_v28  ;;  %670 = vmatpush3.bf16.msra.mxu0 %v755_v7 }
  0x62   :  { %382 = vmatprep.subr.bf16.mxu1 %v724_v29  ;;  %671 = vmatprep.subr.bf16.mxu0 %v756_v8 }
  0x65   :  { %383 = vmatpush1.bf16.msra.mxu1 %v726_v30  ;;  %672 = vmatpush3.bf16.msra.mxu0 %v757_v9 }
  0x66   :  { %384 = vmatprep.subr.bf16.mxu1 %v727_v31 }
  0x69   :  { %385 = vmatpush1.bf16.msra.mxu1 %v729_v32 }
  0x6a   :  { %386 = vmatprep.subr.bf16.mxu1 %v730_v33 }
  0x6d   :  { %387 = vmatpush1.bf16.msra.mxu1 %v732_v34 }
  0x6e   :  { %388 = vmatprep.subr.bf16.mxu1 %v733_v35 }
  0x71   :  { %389 = vmatpush1.bf16.msra.mxu1 %v735_v36 }
  0x72   :  { %390 = vmatprep.subr.bf16.mxu1 %v736_v37 }
  0x75   :  { %391 = vmatpush1.bf16.msra.mxu1 %v738_v38 }
  0x76   :  { %392 = vmatprep.subr.bf16.mxu1 %v739_v39 }
  0x79   :  { %393 = vmatpush1.bf16.msra.mxu1 %v741_v40 }
  0xce   :  { %v447_v26 = vpop.permute.xlu0 %446 }
 0x117   :  { %v147_v60 = vpop.f32.mrb[0].mxu0 }
 0x118   :  { %v148_v61 = vadd.f32 %v147_v60, %v80_v58  ;;  %v149_v62 = vpop.f32.mrb[1].mxu0 }
 0x119   :  { %v150_v63 = vadd.f32 %v149_v62, %v84_v59  ;;  %v151_v0 = vpop.f32.mrb[2].mxu0 }
 0x11a   :  { %v154_v1 = vmax.f32 %v148_v61, 0.0  ;;  %v152_v2 = vpop.f32.mrb[3].mxu0 }
 0x11b   :  { %v155_v3 = vmax.f32 %v150_v63, 0.0 }
 0x11c   :  { %v156_v5 = vpack.c.bf16 %v154_v1, %v154_v1 }
 0x11d   :  { %v157_v4 = vpack.c.bf16 %v155_v3, %v155_v3 }
 0x11f   :  { %394 = vmatprep.mubr.bf16.mxu1 %v157_v4 }
 0x120   :  { %395 = vmatmul.mubr.bf16.vlgmr.msra.gmra.mrb[0].mxu1 %v156_v5 }
 0x1f3   :  { %v396_v14 = vpop.f32.mrb[0].mxu1 }
 0x1f4   :  { %v397_v15 = vadd.f32 %v396_v14, %v195_v12  ;;  %v398_v16 = vpop.f32.mrb[1].mxu1 }
 0x1f5   :  { %v399_v17 = vadd.f32 %v398_v16, %v199_v13  ;;  %v400_v18 = vpop.f32.mrb[2].mxu1 }
 0x1f6   :  { %v403_v19 = vmax.f32 %v397_v15, 0.0  ;;  %v401_v20 = vpop.f32.mrb[3].mxu1 }
 0x1f7   :  { %v404_v21 = vmax.f32 %v399_v17, 0.0 }
 0x1f8   :  { %v405_v23 = vpack.c.bf16 %v403_v19, %v403_v19 }
 0x1f9   :  { %v406_v22 = vpack.c.bf16 %v404_v21, %v404_v21 }
 0x1fb   :  { %577 = vmatprep.mubr.bf16.mxu0 %v406_v22 }
 0x1fc   :  { %578 = vmatmul.mubr.bf16.vlgmr.msra.gmra.mrb[4].mxu0 %v405_v23 }
 0x2cf   :  { %v673_v24 = vpop.f32.mrb[4].mxu0 }
 0x2d0   :  { %v674_v25 = vpop.f32.mrb[5].mxu0 }
 0x2d1   :  { %v675_v27 = vadd.f32 %v674_v25, %v673_v24  ;;  %v676_v28 = vpop.f32.mrb[6].mxu0 }
 0x2d2   :  { %v677_v29 = vpop.f32.mrb[7].mxu0 }
 0x2d3   :  { %v580_v30 = vadd.f32 %v675_v27, %v447_v26 }
 0x2d5   :  { %585 = vst [vmem:[#allocation9] sm:$0x3] %v580_v30 }
 0x2d6   :  { %835 = shalt.err (!%p832_p0)
}
 0x2d7   :  { %s836_s23 = scalar_lea.hbm %s975_s7, 32 }
 0x2d8   :  { %p837_p1 = scmp.ne.s32.totalorder %s975_s7, %s836_s23  ;;  %p840_p2 = scmp.lt.u32.totalorder %s836_s23, %s975_s7 }
 0x2da   :  { %p842_p3 = pnand %p840_p2, %p837_p1 }
 0x2dc   :  { %845 = shalt.err (!%p842_p3)
}
 0x2dd   :  { %595 = dma.vmem_to_hbm [thread:$0]  %s593_s20, 32, %s975_s7, [#allocation5]  }
 0x2de   :  { %850 = dma.done.wait [#allocation5], 32  }
 0x2df   :  { %851 = vsyncadd [#allocation5], 4294967264 }
 0x2e0   :  { %599 = vsyncpa [#allocation4], 1 }
 0x2e1   :  { %600 = vsyncpa [#allocation7], 1 }
 0x2e2   :  { %601 = vsyncpa [#allocation5], 1 }

</bundles_post_ra>
